<compile_context>
chip_gen: v5e
topology: v5e:2x2
jax: 0.10.0
libtpu: 0.0.40
codegen_flags: <defaults>
</compile_context>

<pallas_src>
import functools

import jax
import jax.numpy as jnp
from jax.experimental import pallas as pl
from jax.experimental.pallas import tpu as pltpu


def _layernorm(x, gamma, beta, eps):
    mean = jnp.mean(x, axis=-1, keepdims=True)
    var = jnp.mean((x - mean) ** 2, axis=-1, keepdims=True)
    return (x - mean) * jax.lax.rsqrt(var + eps) * gamma + beta


def _attention_kernel(x_ref, gamma_ref, beta_ref, wqkv_ref, wout_ref, bout_ref,
                      o_ref, slab_ref, *, heads, dim_head, tq, eps):
    # Per grid step (b, qi):
    #   x_ref   : (1, N, D)   full sequence of batch b (f32)
    #   gamma   : (1, D)  beta : (1, D)  bout : (1, D)        (f32)
    #   wqkv    : (D, 3*inner)  bf16 (transposed for x @ W)
    #   wout    : (inner, D)    bf16
    #   o_ref   : (1, tq, D)   query tile qi of batch b
    #   slab_ref: (tq, inner)  f32 VMEM scratch (per-head outputs, lane-dense)
    inner = heads * dim_head
    scale = dim_head ** (-0.5)

    gamma = gamma_ref[...]
    beta = beta_ref[...]
    wqkv = wqkv_ref[...]                                  # bf16 (D, 3*inner)
    wout = wout_ref[...]                                  # bf16 (inner, D)

    # ---- LayerNorm over the full sequence (needed for K and V), f32 stats ----
    x_all = x_ref[0].astype(jnp.float32)                  # (N, D)
    xn_all = _layernorm(x_all, gamma, beta, eps).astype(jnp.bfloat16)

    # ---- K/V projection for the whole sequence (bf16 x bf16 -> f32 acc) ----
    kv = jnp.dot(xn_all, wqkv[:, inner:],
                 preferred_element_type=jnp.float32)       # (N, 2*inner)
    kv_b = kv.astype(jnp.bfloat16)

    # ---- Q projection for this query tile only ----
    q_start = pl.multiple_of(pl.program_id(1) * tq, tq)
    x_q = x_ref[0, pl.ds(q_start, tq), :].astype(jnp.float32)   # (tq, D)
    xn_q = _layernorm(x_q, gamma, beta, eps).astype(jnp.bfloat16)
    q = jnp.dot(xn_q, wqkv[:, :inner],
                preferred_element_type=jnp.float32) * scale     # scale folded here
    q_b = q.astype(jnp.bfloat16)                                # (tq, inner)

    # ---- per-head 2-D attention, softmax in f32 ----
    for h in range(heads):
        c0 = h * dim_head
        q_h = q_b[:, c0:c0 + dim_head]                          # (tq, dh) bf16
        k_h = kv_b[:, c0:c0 + dim_head]                         # (N,  dh) bf16
        v_h = kv_b[:, inner + c0:inner + c0 + dim_head]         # (N,  dh) bf16

        # s[i, j] = sum_d q_h[i, d] * k_h[j, d]   (no explicit transpose)
        s = jax.lax.dot_general(q_h, k_h, (((1,), (1,)), ((), ())),
                                preferred_element_type=jnp.float32)  # (tq, N)
        m = jnp.max(s, axis=-1, keepdims=True)
        p = jnp.exp(s - m)
        attn = p * pl.reciprocal(jnp.sum(p, axis=-1, keepdims=True), approx=True)

        out_h = jnp.dot(attn.astype(jnp.bfloat16), v_h,
                        preferred_element_type=jnp.float32)          # (tq, dh)
        slab_ref[:, c0:c0 + dim_head] = out_h

    # ---- output projection (Linear with bias) ----
    o = jnp.dot(slab_ref[...].astype(jnp.bfloat16), wout,
                preferred_element_type=jnp.float32) + bout_ref[...]
    o_ref[0] = o.astype(o_ref.dtype)


def attention_pallas(x, gamma, beta, w_qkv_t, w_out_t, b_out,
                     *, heads, dim_head, eps=1e-5):
    """x: (B, N, D) float32.  Weights given in f32 (cast to bf16 internally)."""
    B, N, D = x.shape
    inner = heads * dim_head

    # Query tile: 128 rows when it divides N, otherwise the whole sequence.
    tq = 128 if (N > 128 and N % 128 == 0) else N
    nq = N // tq

    # bf16 MXU operands; accumulation stays f32 inside the kernel.
    wqkv_b = w_qkv_t.astype(jnp.bfloat16)
    wout_b = w_out_t.astype(jnp.bfloat16)

    kernel = functools.partial(_attention_kernel, heads=heads,
                               dim_head=dim_head, tq=tq, eps=eps)

    flops = (2 * B * N * D * 3 * inner            # qkv projection
             + 4 * B * heads * N * N * dim_head   # q@k^T and attn@v
             + 2 * B * N * inner * D)             # output projection
    transcendentals = B * heads * N * N + B * N   # exp + rsqrt
    bytes_accessed = (2 * x.size * 4              # x in + out
                      + wqkv_b.size * 2 + wout_b.size * 2
                      + (gamma.size + beta.size + b_out.size) * 4)

    return pl.pallas_call(
        kernel,
        out_shape=jax.ShapeDtypeStruct((B, N, D), x.dtype),
        grid_spec=pltpu.PrefetchScalarGridSpec(
            num_scalar_prefetch=0,
            grid=(B, nq),
            in_specs=[
                pl.BlockSpec((1, N, D), lambda b, q: (b, 0, 0)),      # x (full seq)
                pl.BlockSpec((1, D), lambda b, q: (0, 0)),            # gamma
                pl.BlockSpec((1, D), lambda b, q: (0, 0)),            # beta
                pl.BlockSpec((D, 3 * inner), lambda b, q: (0, 0)),    # W_qkv^T bf16
                pl.BlockSpec((inner, D), lambda b, q: (0, 0)),        # W_out^T bf16
                pl.BlockSpec((1, D), lambda b, q: (0, 0)),            # b_out
            ],
            out_specs=pl.BlockSpec((1, tq, D), lambda b, q: (b, q, 0)),
            scratch_shapes=[pltpu.VMEM((tq, inner), jnp.float32)],
        ),
        compiler_params=pltpu.CompilerParams(
            dimension_semantics=("parallel", "parallel"),
            vmem_limit_bytes=32 * 1024 * 1024),
        cost_estimate=pl.CostEstimate(flops=flops,
                                      transcendentals=transcendentals,
                                      bytes_accessed=bytes_accessed),
    )(x, gamma, beta, wqkv_b, wout_b, b_out)


def attention_reference(x, gamma, beta, w_qkv_t, w_out_t, b_out,
                        *, heads, dim_head, eps=1e-5):
    """Pure-JAX f32 reference mirroring the PyTorch forward (dropout=identity)."""
    B, N, D = x.shape
    inner = heads * dim_head
    scale = dim_head ** (-0.5)
    mean = jnp.mean(x, axis=-1, keepdims=True)
    var = jnp.mean((x - mean) ** 2, axis=-1, keepdims=True)
    xn = (x - mean) / jnp.sqrt(var + eps) * gamma + beta
    qkv = xn @ w_qkv_t
    q, k, v = jnp.split(qkv, 3, axis=-1)

    def split_heads(t):
        return t.reshape(B, N, heads, dim_head).transpose(0, 2, 1, 3)

    q, k, v = map(split_heads, (q, k, v))
    dots = jnp.einsum('bhid,bhjd->bhij', q, k) * scale
    attn = jax.nn.softmax(dots, axis=-1)
    out = jnp.einsum('bhij,bhjd->bhid', attn, v)
    out = out.transpose(0, 2, 1, 3).reshape(B, N, inner)
    return out @ w_out_t + b_out


if __name__ == "__main__":
    # Small shapes consistent with the module.
    B, N, D = 2, 8, 32
    heads, dim_head = 4, 16
    inner = heads * dim_head          # 64 != D -> project_out=True

    key = jax.random.PRNGKey(0)
    k_x, k_qkv, k_out, k_b = jax.random.split(key, 4)

    x = jax.random.normal(k_x, (B, N, D), dtype=jnp.float32)

    # PyTorch Linear stores W as (out, in); we pass (in, out) for x @ W.
    gamma = jnp.ones((1, D), dtype=jnp.float32)       # LayerNorm weight
    beta = jnp.zeros((1, D), dtype=jnp.float32)       # LayerNorm bias
    w_qkv_t = 0.02 * jax.random.normal(k_qkv, (D, 3 * inner), dtype=jnp.float32)
    w_out_t = 0.02 * jax.random.normal(k_out, (inner, D), dtype=jnp.float32)
    b_out = 0.01 * jax.random.normal(k_b, (1, D), dtype=jnp.float32)

    out = attention_pallas(x, gamma, beta, w_qkv_t, w_out_t, b_out,
                           heads=heads, dim_head=dim_head)
    out = jax.block_until_ready(out)

    ref = attention_reference(x, gamma, beta, w_qkv_t, w_out_t, b_out,
                              heads=heads, dim_head=dim_head)

    assert out.shape == (B, N, D)
    # bf16 matmul operands + approx reciprocal -> slightly looser tolerance.
    assert jnp.allclose(out, ref, atol=2e-2, rtol=2e-2), (
        f"max abs err {jnp.max(jnp.abs(out - ref))}")
    print("KERNEL_OK")
</pallas_src>

<mosaic_0001>
module attributes {stable_mosaic.version = 11 : i64} {
  func.func @_attention_kernel(%arg0: i32, %arg1: i32, %arg2: memref<1x8x32xf32, #tpu.memory_space<vmem>>, %arg3: memref<1x32xf32, #tpu.memory_space<vmem>>, %arg4: memref<1x32xf32, #tpu.memory_space<vmem>>, %arg5: memref<32x192xbf16, #tpu.memory_space<vmem>>, %arg6: memref<64x32xbf16, #tpu.memory_space<vmem>>, %arg7: memref<1x32xf32, #tpu.memory_space<vmem>>, %arg8: memref<1x8x32xf32, #tpu.memory_space<vmem>>, %arg9: memref<8x64xf32, #tpu.memory_space<vmem>>) attributes {dimension_semantics = [#tpu.dimension_semantics<parallel>, #tpu.dimension_semantics<parallel>], iteration_bounds = array<i64: 2, 1>, scalar_prefetch = 0 : i64, scratch_operands = 1 : i64, tpu.core_type = #tpu.core_type<tc>, window_params = [{transform_indices = @transform_0, window_bounds = array<i64: 1, 8, 32>}, {pipeline_mode = #tpu.pipeline_mode<synchronous>, transform_indices = @transform_1, window_bounds = array<i64: 1, 32>}, {pipeline_mode = #tpu.pipeline_mode<synchronous>, transform_indices = @transform_2, window_bounds = array<i64: 1, 32>}, {pipeline_mode = #tpu.pipeline_mode<synchronous>, transform_indices = @transform_3, window_bounds = array<i64: 32, 192>}, {pipeline_mode = #tpu.pipeline_mode<synchronous>, transform_indices = @transform_4, window_bounds = array<i64: 64, 32>}, {pipeline_mode = #tpu.pipeline_mode<synchronous>, transform_indices = @transform_5, window_bounds = array<i64: 1, 32>}, {transform_indices = @transform_6, window_bounds = array<i64: 1, 8, 32>}]} {
    %c0 = arith.constant 0 : index
    %c0_0 = arith.constant 0 : index
    %0 = vector.load %arg3[%c0, %c0_0] : memref<1x32xf32, #tpu.memory_space<vmem>>, vector<1x32xf32>
    %c0_1 = arith.constant 0 : index
    %c0_2 = arith.constant 0 : index
    %1 = vector.load %arg4[%c0_1, %c0_2] : memref<1x32xf32, #tpu.memory_space<vmem>>, vector<1x32xf32>
    %c0_3 = arith.constant 0 : index
    %c0_4 = arith.constant 0 : index
    %2 = vector.load %arg5[%c0_3, %c0_4] : memref<32x192xbf16, #tpu.memory_space<vmem>>, vector<32x192xbf16>
    %c0_5 = arith.constant 0 : index
    %c0_6 = arith.constant 0 : index
    %3 = vector.load %arg6[%c0_5, %c0_6] : memref<64x32xbf16, #tpu.memory_space<vmem>>, vector<64x32xbf16>
    %c0_7 = arith.constant 0 : index
    %c0_8 = arith.constant 0 : index
    %c0_9 = arith.constant 0 : index
    %4 = vector.load %arg2[%c0_7, %c0_8, %c0_9] : memref<1x8x32xf32, #tpu.memory_space<vmem>>, vector<1x8x32xf32>
    %5 = vector.shape_cast %4 : vector<1x8x32xf32> to vector<8x32xf32>
    %cst = arith.constant dense<0.000000e+00> : vector<8xf32>
    %6 = vector.multi_reduction <add>, %5, %cst [1] : vector<8x32xf32> to vector<8xf32>
    %7 = vector.shape_cast %6 : vector<8xf32> to vector<8x1xf32>
    %cst_10 = arith.constant 3.200000e+01 : f32
    %8 = vector.broadcast %cst_10 : f32 to vector<8x1xf32>
    %9 = arith.divf %7, %8 : vector<8x1xf32>
    %10 = vector.broadcast %9 : vector<8x1xf32> to vector<8x32xf32>
    %11 = arith.subf %5, %10 : vector<8x32xf32>
    %12 = arith.mulf %11, %11 : vector<8x32xf32>
    %cst_11 = arith.constant dense<0.000000e+00> : vector<8xf32>
    %13 = vector.multi_reduction <add>, %12, %cst_11 [1] : vector<8x32xf32> to vector<8xf32>
    %14 = vector.shape_cast %13 : vector<8xf32> to vector<8x1xf32>
    %cst_12 = arith.constant 3.200000e+01 : f32
    %15 = vector.broadcast %cst_12 : f32 to vector<8x1xf32>
    %16 = arith.divf %14, %15 : vector<8x1xf32>
    %17 = vector.broadcast %9 : vector<8x1xf32> to vector<8x32xf32>
    %18 = arith.subf %5, %17 : vector<8x32xf32>
    %cst_13 = arith.constant 9.99999974E-6 : f32
    %19 = vector.broadcast %cst_13 : f32 to vector<8x1xf32>
    %20 = arith.addf %16, %19 : vector<8x1xf32>
    %21 = math.rsqrt %20 : vector<8x1xf32>
    %22 = vector.broadcast %21 : vector<8x1xf32> to vector<8x32xf32>
    %23 = arith.mulf %18, %22 : vector<8x32xf32>
    %24 = vector.broadcast %0 : vector<1x32xf32> to vector<8x32xf32>
    %25 = arith.mulf %23, %24 : vector<8x32xf32>
    %26 = vector.broadcast %1 : vector<1x32xf32> to vector<8x32xf32>
    %27 = arith.addf %25, %26 : vector<8x32xf32>
    %28 = arith.truncf %27 : vector<8x32xf32> to vector<8x32xbf16>
    %29 = vector.extract_strided_slice %2 {offsets = [0, 64], sizes = [32, 128], strides = [1, 1]} : vector<32x192xbf16> to vector<32x128xbf16>
    %cst_14 = arith.constant dense<0.000000e+00> : vector<8x128xf32>
    %30 = tpu.matmul %28, %29, %cst_14 {dimension_numbers = #tpu.dot_dimension_numbers<[1], [0], [0], [1], [0, 0, 1, 1], [], []>} : vector<8x32xbf16>, vector<32x128xbf16>, vector<8x128xf32> -> vector<8x128xf32>
    %31 = arith.truncf %30 : vector<8x128xf32> to vector<8x128xbf16>
    %c8_i32 = arith.constant 8 : i32
    %32 = arith.muli %arg1, %c8_i32 : i32
    %33 = tpu.assume_multiple %32, 8 : i32
    %c0_15 = arith.constant 0 : index
    %34 = arith.index_cast %33 : i32 to index
    %c0_16 = arith.constant 0 : index
    %35 = vector.load %arg2[%c0_15, %34, %c0_16] : memref<1x8x32xf32, #tpu.memory_space<vmem>>, vector<1x8x32xf32>
    %36 = vector.shape_cast %35 : vector<1x8x32xf32> to vector<8x32xf32>
    %cst_17 = arith.constant dense<0.000000e+00> : vector<8xf32>
    %37 = vector.multi_reduction <add>, %36, %cst_17 [1] : vector<8x32xf32> to vector<8xf32>
    %38 = vector.shape_cast %37 : vector<8xf32> to vector<8x1xf32>
    %cst_18 = arith.constant 3.200000e+01 : f32
    %39 = vector.broadcast %cst_18 : f32 to vector<8x1xf32>
    %40 = arith.divf %38, %39 : vector<8x1xf32>
    %41 = vector.broadcast %40 : vector<8x1xf32> to vector<8x32xf32>
    %42 = arith.subf %36, %41 : vector<8x32xf32>
    %43 = arith.mulf %42, %42 : vector<8x32xf32>
    %cst_19 = arith.constant dense<0.000000e+00> : vector<8xf32>
    %44 = vector.multi_reduction <add>, %43, %cst_19 [1] : vector<8x32xf32> to vector<8xf32>
    %45 = vector.shape_cast %44 : vector<8xf32> to vector<8x1xf32>
    %cst_20 = arith.constant 3.200000e+01 : f32
    %46 = vector.broadcast %cst_20 : f32 to vector<8x1xf32>
    %47 = arith.divf %45, %46 : vector<8x1xf32>
    %48 = vector.broadcast %40 : vector<8x1xf32> to vector<8x32xf32>
    %49 = arith.subf %36, %48 : vector<8x32xf32>
    %cst_21 = arith.constant 9.99999974E-6 : f32
    %50 = vector.broadcast %cst_21 : f32 to vector<8x1xf32>
    %51 = arith.addf %47, %50 : vector<8x1xf32>
    %52 = math.rsqrt %51 : vector<8x1xf32>
    %53 = vector.broadcast %52 : vector<8x1xf32> to vector<8x32xf32>
    %54 = arith.mulf %49, %53 : vector<8x32xf32>
    %55 = vector.broadcast %0 : vector<1x32xf32> to vector<8x32xf32>
    %56 = arith.mulf %54, %55 : vector<8x32xf32>
    %57 = vector.broadcast %1 : vector<1x32xf32> to vector<8x32xf32>
    %58 = arith.addf %56, %57 : vector<8x32xf32>
    %59 = arith.truncf %58 : vector<8x32xf32> to vector<8x32xbf16>
    %60 = vector.extract_strided_slice %2 {offsets = [0, 0], sizes = [32, 64], strides = [1, 1]} : vector<32x192xbf16> to vector<32x64xbf16>
    %cst_22 = arith.constant dense<0.000000e+00> : vector<8x64xf32>
    %61 = tpu.matmul %59, %60, %cst_22 {dimension_numbers = #tpu.dot_dimension_numbers<[1], [0], [0], [1], [0, 0, 1, 1], [], []>} : vector<8x32xbf16>, vector<32x64xbf16>, vector<8x64xf32> -> vector<8x64xf32>
    %cst_23 = arith.constant 2.500000e-01 : f32
    %62 = vector.broadcast %cst_23 : f32 to vector<8x64xf32>
    %63 = arith.mulf %61, %62 : vector<8x64xf32>
    %64 = arith.truncf %63 : vector<8x64xf32> to vector<8x64xbf16>
    %65 = vector.extract_strided_slice %64 {offsets = [0, 0], sizes = [8, 16], strides = [1, 1]} : vector<8x64xbf16> to vector<8x16xbf16>
    %66 = vector.extract_strided_slice %31 {offsets = [0, 0], sizes = [8, 16], strides = [1, 1]} : vector<8x128xbf16> to vector<8x16xbf16>
    %67 = vector.extract_strided_slice %31 {offsets = [0, 64], sizes = [8, 16], strides = [1, 1]} : vector<8x128xbf16> to vector<8x16xbf16>
    %cst_24 = arith.constant dense<0.000000e+00> : vector<8x8xf32>
    %68 = tpu.matmul %65, %66, %cst_24 {dimension_numbers = #tpu.dot_dimension_numbers<[1], [1], [0], [0], [0, 0, 1, 0], [], []>} : vector<8x16xbf16>, vector<8x16xbf16>, vector<8x8xf32> -> vector<8x8xf32>
    %cst_25 = arith.constant dense<0xFF800000> : vector<8xf32>
    %69 = vector.multi_reduction <maximumf>, %68, %cst_25 [1] : vector<8x8xf32> to vector<8xf32>
    %70 = vector.shape_cast %69 : vector<8xf32> to vector<8x1xf32>
    %71 = vector.broadcast %70 : vector<8x1xf32> to vector<8x8xf32>
    %72 = arith.subf %68, %71 : vector<8x8xf32>
    %73 = math.exp %72 : vector<8x8xf32>
    %cst_26 = arith.constant dense<0.000000e+00> : vector<8xf32>
    %74 = vector.multi_reduction <add>, %73, %cst_26 [1] : vector<8x8xf32> to vector<8xf32>
    %75 = vector.shape_cast %74 : vector<8xf32> to vector<8x1xf32>
    %76 = tpu.reciprocal %75 {approx = true} : vector<8x1xf32> -> vector<8x1xf32>
    %77 = vector.broadcast %76 : vector<8x1xf32> to vector<8x8xf32>
    %78 = arith.mulf %73, %77 : vector<8x8xf32>
    %79 = arith.truncf %78 : vector<8x8xf32> to vector<8x8xbf16>
    %cst_27 = arith.constant dense<0.000000e+00> : vector<8x16xf32>
    %80 = tpu.matmul %79, %67, %cst_27 {dimension_numbers = #tpu.dot_dimension_numbers<[1], [0], [0], [1], [0, 0, 1, 1], [], []>} : vector<8x8xbf16>, vector<8x16xbf16>, vector<8x16xf32> -> vector<8x16xf32>
    %c0_28 = arith.constant 0 : index
    %c0_29 = arith.constant 0 : index
    %81 = vector.load %arg9[%c0_28, %c0_29] : memref<8x64xf32, #tpu.memory_space<vmem>>, vector<8x16xf32>
    tpu.vector_store %arg9[%c0_28, %c0_29], %80 {strides = array<i32>} : memref<8x64xf32, #tpu.memory_space<vmem>>, vector<8x16xf32>,
    %82 = vector.extract_strided_slice %64 {offsets = [0, 16], sizes = [8, 16], strides = [1, 1]} : vector<8x64xbf16> to vector<8x16xbf16>
    %83 = vector.extract_strided_slice %31 {offsets = [0, 16], sizes = [8, 16], strides = [1, 1]} : vector<8x128xbf16> to vector<8x16xbf16>
    %84 = vector.extract_strided_slice %31 {offsets = [0, 80], sizes = [8, 16], strides = [1, 1]} : vector<8x128xbf16> to vector<8x16xbf16>
    %cst_30 = arith.constant dense<0.000000e+00> : vector<8x8xf32>
    %85 = tpu.matmul %82, %83, %cst_30 {dimension_numbers = #tpu.dot_dimension_numbers<[1], [1], [0], [0], [0, 0, 1, 0], [], []>} : vector<8x16xbf16>, vector<8x16xbf16>, vector<8x8xf32> -> vector<8x8xf32>
    %cst_31 = arith.constant dense<0xFF800000> : vector<8xf32>
    %86 = vector.multi_reduction <maximumf>, %85, %cst_31 [1] : vector<8x8xf32> to vector<8xf32>
    %87 = vector.shape_cast %86 : vector<8xf32> to vector<8x1xf32>
    %88 = vector.broadcast %87 : vector<8x1xf32> to vector<8x8xf32>
    %89 = arith.subf %85, %88 : vector<8x8xf32>
    %90 = math.exp %89 : vector<8x8xf32>
    %cst_32 = arith.constant dense<0.000000e+00> : vector<8xf32>
    %91 = vector.multi_reduction <add>, %90, %cst_32 [1] : vector<8x8xf32> to vector<8xf32>
    %92 = vector.shape_cast %91 : vector<8xf32> to vector<8x1xf32>
    %93 = tpu.reciprocal %92 {approx = true} : vector<8x1xf32> -> vector<8x1xf32>
    %94 = vector.broadcast %93 : vector<8x1xf32> to vector<8x8xf32>
    %95 = arith.mulf %90, %94 : vector<8x8xf32>
    %96 = arith.truncf %95 : vector<8x8xf32> to vector<8x8xbf16>
    %cst_33 = arith.constant dense<0.000000e+00> : vector<8x16xf32>
    %97 = tpu.matmul %96, %84, %cst_33 {dimension_numbers = #tpu.dot_dimension_numbers<[1], [0], [0], [1], [0, 0, 1, 1], [], []>} : vector<8x8xbf16>, vector<8x16xbf16>, vector<8x16xf32> -> vector<8x16xf32>
    %c0_34 = arith.constant 0 : index
    %c16 = arith.constant 16 : index
    %98 = vector.load %arg9[%c0_34, %c16] : memref<8x64xf32, #tpu.memory_space<vmem>>, vector<8x16xf32>
    tpu.vector_store %arg9[%c0_34, %c16], %97 {strides = array<i32>} : memref<8x64xf32, #tpu.memory_space<vmem>>, vector<8x16xf32>,
    %99 = vector.extract_strided_slice %64 {offsets = [0, 32], sizes = [8, 16], strides = [1, 1]} : vector<8x64xbf16> to vector<8x16xbf16>
    %100 = vector.extract_strided_slice %31 {offsets = [0, 32], sizes = [8, 16], strides = [1, 1]} : vector<8x128xbf16> to vector<8x16xbf16>
    %101 = vector.extract_strided_slice %31 {offsets = [0, 96], sizes = [8, 16], strides = [1, 1]} : vector<8x128xbf16> to vector<8x16xbf16>
    %cst_35 = arith.constant dense<0.000000e+00> : vector<8x8xf32>
    %102 = tpu.matmul %99, %100, %cst_35 {dimension_numbers = #tpu.dot_dimension_numbers<[1], [1], [0], [0], [0, 0, 1, 0], [], []>} : vector<8x16xbf16>, vector<8x16xbf16>, vector<8x8xf32> -> vector<8x8xf32>
    %cst_36 = arith.constant dense<0xFF800000> : vector<8xf32>
    %103 = vector.multi_reduction <maximumf>, %102, %cst_36 [1] : vector<8x8xf32> to vector<8xf32>
    %104 = vector.shape_cast %103 : vector<8xf32> to vector<8x1xf32>
    %105 = vector.broadcast %104 : vector<8x1xf32> to vector<8x8xf32>
    %106 = arith.subf %102, %105 : vector<8x8xf32>
    %107 = math.exp %106 : vector<8x8xf32>
    %cst_37 = arith.constant dense<0.000000e+00> : vector<8xf32>
    %108 = vector.multi_reduction <add>, %107, %cst_37 [1] : vector<8x8xf32> to vector<8xf32>
    %109 = vector.shape_cast %108 : vector<8xf32> to vector<8x1xf32>
    %110 = tpu.reciprocal %109 {approx = true} : vector<8x1xf32> -> vector<8x1xf32>
    %111 = vector.broadcast %110 : vector<8x1xf32> to vector<8x8xf32>
    %112 = arith.mulf %107, %111 : vector<8x8xf32>
    %113 = arith.truncf %112 : vector<8x8xf32> to vector<8x8xbf16>
    %cst_38 = arith.constant dense<0.000000e+00> : vector<8x16xf32>
    %114 = tpu.matmul %113, %101, %cst_38 {dimension_numbers = #tpu.dot_dimension_numbers<[1], [0], [0], [1], [0, 0, 1, 1], [], []>} : vector<8x8xbf16>, vector<8x16xbf16>, vector<8x16xf32> -> vector<8x16xf32>
    %c0_39 = arith.constant 0 : index
    %c32 = arith.constant 32 : index
    %115 = vector.load %arg9[%c0_39, %c32] : memref<8x64xf32, #tpu.memory_space<vmem>>, vector<8x16xf32>
    tpu.vector_store %arg9[%c0_39, %c32], %114 {strides = array<i32>} : memref<8x64xf32, #tpu.memory_space<vmem>>, vector<8x16xf32>,
    %116 = vector.extract_strided_slice %64 {offsets = [0, 48], sizes = [8, 16], strides = [1, 1]} : vector<8x64xbf16> to vector<8x16xbf16>
    %117 = vector.extract_strided_slice %31 {offsets = [0, 48], sizes = [8, 16], strides = [1, 1]} : vector<8x128xbf16> to vector<8x16xbf16>
    %118 = vector.extract_strided_slice %31 {offsets = [0, 112], sizes = [8, 16], strides = [1, 1]} : vector<8x128xbf16> to vector<8x16xbf16>
    %cst_40 = arith.constant dense<0.000000e+00> : vector<8x8xf32>
    %119 = tpu.matmul %116, %117, %cst_40 {dimension_numbers = #tpu.dot_dimension_numbers<[1], [1], [0], [0], [0, 0, 1, 0], [], []>} : vector<8x16xbf16>, vector<8x16xbf16>, vector<8x8xf32> -> vector<8x8xf32>
    %cst_41 = arith.constant dense<0xFF800000> : vector<8xf32>
    %120 = vector.multi_reduction <maximumf>, %119, %cst_41 [1] : vector<8x8xf32> to vector<8xf32>
    %121 = vector.shape_cast %120 : vector<8xf32> to vector<8x1xf32>
    %122 = vector.broadcast %121 : vector<8x1xf32> to vector<8x8xf32>
    %123 = arith.subf %119, %122 : vector<8x8xf32>
    %124 = math.exp %123 : vector<8x8xf32>
    %cst_42 = arith.constant dense<0.000000e+00> : vector<8xf32>
    %125 = vector.multi_reduction <add>, %124, %cst_42 [1] : vector<8x8xf32> to vector<8xf32>
    %126 = vector.shape_cast %125 : vector<8xf32> to vector<8x1xf32>
    %127 = tpu.reciprocal %126 {approx = true} : vector<8x1xf32> -> vector<8x1xf32>
    %128 = vector.broadcast %127 : vector<8x1xf32> to vector<8x8xf32>
    %129 = arith.mulf %124, %128 : vector<8x8xf32>
    %130 = arith.truncf %129 : vector<8x8xf32> to vector<8x8xbf16>
    %cst_43 = arith.constant dense<0.000000e+00> : vector<8x16xf32>
    %131 = tpu.matmul %130, %118, %cst_43 {dimension_numbers = #tpu.dot_dimension_numbers<[1], [0], [0], [1], [0, 0, 1, 1], [], []>} : vector<8x8xbf16>, vector<8x16xbf16>, vector<8x16xf32> -> vector<8x16xf32>
    %c0_44 = arith.constant 0 : index
    %c48 = arith.constant 48 : index
    %132 = vector.load %arg9[%c0_44, %c48] : memref<8x64xf32, #tpu.memory_space<vmem>>, vector<8x16xf32>
    tpu.vector_store %arg9[%c0_44, %c48], %131 {strides = array<i32>} : memref<8x64xf32, #tpu.memory_space<vmem>>, vector<8x16xf32>,
    %c0_45 = arith.constant 0 : index
    %c0_46 = arith.constant 0 : index
    %133 = vector.load %arg9[%c0_45, %c0_46] : memref<8x64xf32, #tpu.memory_space<vmem>>, vector<8x64xf32>
    %134 = arith.truncf %133 : vector<8x64xf32> to vector<8x64xbf16>
    %cst_47 = arith.constant dense<0.000000e+00> : vector<8x32xf32>
    %135 = tpu.matmul %134, %3, %cst_47 {dimension_numbers = #tpu.dot_dimension_numbers<[1], [0], [0], [1], [0, 0, 1, 1], [], []>} : vector<8x64xbf16>, vector<64x32xbf16>, vector<8x32xf32> -> vector<8x32xf32>
    %c0_48 = arith.constant 0 : index
    %c0_49 = arith.constant 0 : index
    %136 = vector.load %arg7[%c0_48, %c0_49] : memref<1x32xf32, #tpu.memory_space<vmem>>, vector<1x32xf32>
    %137 = vector.broadcast %136 : vector<1x32xf32> to vector<8x32xf32>
    %138 = arith.addf %135, %137 : vector<8x32xf32>
    %c0_50 = arith.constant 0 : index
    %c0_51 = arith.constant 0 : index
    %c0_52 = arith.constant 0 : index
    %139 = vector.load %arg8[%c0_50, %c0_51, %c0_52] : memref<1x8x32xf32, #tpu.memory_space<vmem>>, vector<1x8x32xf32>
    %140 = vector.shape_cast %139 : vector<1x8x32xf32> to vector<8x32xf32>
    %141 = vector.shape_cast %138 : vector<8x32xf32> to vector<1x8x32xf32>
    tpu.vector_store %arg8[%c0_50, %c0_51, %c0_52], %141 {strides = array<i32>} : memref<1x8x32xf32, #tpu.memory_space<vmem>>, vector<1x8x32xf32>,
    return
  }
  func.func @transform_0(%arg0: i32, %arg1: i32) -> (i32, i32, i32) {
    %c0_i32 = arith.constant 0 : i32
    %c0_i32_0 = arith.constant 0 : i32
    %c0_i32_1 = arith.constant 0 : i32
    return %arg0, %c0_i32, %c0_i32_0 : i32, i32, i32
  }
  func.func @transform_1(%arg0: i32, %arg1: i32) -> (i32, i32) {
    %c0_i32 = arith.constant 0 : i32
    %c0_i32_0 = arith.constant 0 : i32
    %c0_i32_1 = arith.constant 0 : i32
    return %c0_i32, %c0_i32_0 : i32, i32
  }
  func.func @transform_2(%arg0: i32, %arg1: i32) -> (i32, i32) {
    %c0_i32 = arith.constant 0 : i32
    %c0_i32_0 = arith.constant 0 : i32
    %c0_i32_1 = arith.constant 0 : i32
    return %c0_i32, %c0_i32_0 : i32, i32
  }
  func.func @transform_3(%arg0: i32, %arg1: i32) -> (i32, i32) {
    %c0_i32 = arith.constant 0 : i32
    %c0_i32_0 = arith.constant 0 : i32
    %c0_i32_1 = arith.constant 0 : i32
    return %c0_i32, %c0_i32_0 : i32, i32
  }
  func.func @transform_4(%arg0: i32, %arg1: i32) -> (i32, i32) {
    %c0_i32 = arith.constant 0 : i32
    %c0_i32_0 = arith.constant 0 : i32
    %c0_i32_1 = arith.constant 0 : i32
    return %c0_i32, %c0_i32_0 : i32, i32
  }
  func.func @transform_5(%arg0: i32, %arg1: i32) -> (i32, i32) {
    %c0_i32 = arith.constant 0 : i32
    %c0_i32_0 = arith.constant 0 : i32
    %c0_i32_1 = arith.constant 0 : i32
    return %c0_i32, %c0_i32_0 : i32, i32
  }
  func.func @transform_6(%arg0: i32, %arg1: i32) -> (i32, i32, i32) {
    %c0_i32 = arith.constant 0 : i32
    %c0_i32_0 = arith.constant 0 : i32
    return %arg0, %arg1, %c0_i32 : i32, i32, i32
  }
}

</mosaic_0001>

<bundles_post_ra>
// kernel: tpu_custom_call.1
= control target key start
LH: loop header
LB: loop body
LE: loop exit
PB: predicated region body
PF: predicated region fallthrough
CT: control target
= control target key end

     0   :  { %11 = vsyncpa [#allocation4], 0  ;;  %s1262_s0 = inlined_call_operand.vmem [shape: f32[2,8,32], index: 0, kind: input, shape index: {}]   ;;  %s1263_s1 = inlined_call_operand.vmem [shape: f32[1,32], index: 1, kind: input, shape index: {}]   ;;  %s1264_s2 = inlined_call_operand.vmem [shape: f32[1,32], index: 2, kind: input, shape index: {}]   ;;  %s1265_s3 = inlined_call_operand.vmem [shape: bf16[32,192], index: 3, kind: input, shape index: {}]   ;;  %s1266_s4 = inlined_call_operand.vmem [shape: bf16[64,32], index: 4, kind: input, shape index: {}]   ;;  %s1267_s5 = inlined_call_operand.vmem [shape: f32[1,32], index: 5, kind: input, shape index: {}]   ;;  %s1268_s6 = inlined_call_operand.hbm [shape: f32[2,8,32], index: 6, kind: output, shape index: {}]  }
   0x1   :  { %13 = vsyncpa [#allocation4 + $0x1], 0  ;;  %s1066_s21 = smov 0   ;;  %s1068_s22 = smov 0  }
   0x2   :  { %s1070_s23 = smov 0   ;;  %s1072_s24 = smov 0  }
   0x3   :  { %s1074_s25 = smov 0   ;;  %s1076_s26 = smov 0  }
   0x4 LB: > { %s793_s27 = sadd.s32 4294967295, %s1021_s26   ;;  %s794_s28 = sadd.s32 4294967294, %s1021_s26   ;;  %s1021_s26 = sphi %s1076_s26, %s19_s26   ;;  %s1017_s25 = sphi %s1074_s25, %s1275_s25   ;;  %s1013_s24 = sphi %s1072_s24, %s1274_s24   ;;  %s1009_s23 = sphi %s1070_s23, %s1273_s23   ;;  %s1005_s22 = sphi %s1068_s22, %s1272_s22   ;;  %s1001_s21 = sphi %s1066_s21, %s1271_s21  }
   0x5   : > { %s31_s29 = sadd.s32 1, %s1017_s25  ;;  %s171_s30 = sadd.s32 1, %s1009_s23 }
   0x6   : > { %p33_p0 = scmp.ge.s32.totalorder %s31_s29, 2  ;;  %p181_p1 = scmp.ne.s32.totalorder %s1009_s23, %s1005_s22 }
   0x7   : > { %p182_p2 = scmp.eq.s32.totalorder %s793_s27, 1  ;;  %p187_p3 = scmp.ne.s32.totalorder %s1005_s22, %s1001_s21 }
   0x8   : > { %s1277_s29 = smov (%p33_p0, %s31_s29), 0  ;;  %p188_p5 = scmp.eq.s32.totalorder %s794_s28, 1 }
   0x9   : > { %p1106_p4 = por %p182_p2, %p181_p1  ;;  %s166_s8 = ssub.s32 %s1017_s25, %s1277_s29 }
   0xa   : > { %p797_p6 = scmp.ge.s32.totalorder %s1021_s26, 1  ;;  %p169_p7 = scmp.eq.s32.totalorder %s166_s8, 0 }
   0xb   : > { %p1113_p8 = por %p188_p5, %p187_p3  ;;  %p228_p9 = scmp.lt.s32.totalorder %s1021_s26, 3 }
   0xc   : > { %s1119_s10 = scalar_select %p169_p7, %s1009_s23, %s171_s30  }
   0xd   : > { %p229_p10 = pnand %p797_p6, %p228_p9 }
   0xe   : > { %p257_p11 = scmp.lt.s32.totalorder (!%p229_p10), %s1013_s24, 1  ;;  %s1024_s20 = smov (!%p229_p10), 64  }
   0xf   : > { %232 = sbr.rel (%p229_p10) target bundleno = 1631 (0x65f), region = 44  ;;  %s1025_s8 = smov (!%p229_p10), 112  }
  0x10   : > { %s1029_s13 = smov (!%p229_p10), 32   ;;  %s1030_s14 = smov (!%p229_p10), 16  }
  0x14   : > { %s258_s11 = scalar_select %p257_p11, %s1013_s24, 1  ;;  %vm277_vm0 = vcmask 261120   ;;  %v1023_v2 = vmov 32.0   ;;  %v802_v5 = vld [vmem:[%s1265_s3] sm:$0xf]  ;;  %vm340_vm2 = vcmask 523264  }
  0x15   : > { %921 = vrcp.f32 %v1023_v2  ;;  %v848_v6 = vld [vmem:[%s1265_s3 + $0x4] sm:$0xf0]  ;;  %v810_v19 = vld [vmem:[%s1265_s3 + $0x10] sm:$0xf]  ;;  %v850_v20 = vld [vmem:[%s1265_s3 + $0x14] sm:$0xf0] }
  0x16   : > { %s799_s12 = sshll.u32 %s258_s11, 3  ;;  %v803_v7 = vor.u32 %v848_v6, %v802_v5  ;;  %v811_v21 = vor.u32 %v850_v20, %v810_v19  ;;  %v849_v24 = vld [vmem:[%s1265_s3 + $0x14] sm:$0xf]  ;;  %v812_v25 = vld [vmem:[%s1265_s3 + $0x18] sm:$0xf0]  ;;  %vm410_vm9 = vcmask 130048  }
  0x17   : > { %s260_s15 = scalar_lea.vmem %s1262_s0, %s799_s12  ;;  %v815_v27 = vor.u32 %v849_v24, %v812_v25  ;;  %v847_v28 = vld [vmem:[%s1265_s3 + $0x4] sm:$0xf]  ;;  %v804_v29 = vld [vmem:[%s1265_s3 + $0x8] sm:$0xf0]  ;;  %v918_v51 = vld [vmem:[%s1263_s1] ss:$0 sm:$0xff] }
  0x18   : > { %v276_v0 = vld [vmem:[%s260_s15] sm:$0xff]  ;;  %336 = vrot.lane.b32.xlu2 %v811_v21, %s1024_s20  ;;  %401 = vmatpush.bf16.msra.mxu1 %v811_v21  ;;  %v807_v30 = vor.u32 %v847_v28, %v804_v29  ;;  %s1026_s11 = smov 80   ;;  %s1027_s12 = smov 96   ;;  %vm451_vm10 = vcmask 1043456   ;;  %vm430_vm11 = vcmask 64512   ;;  %vm532_vm12 = vcmask 261248  }
  0x19   : > { %v278_v1 = vsel %vm277_vm0, %v276_v0, 0.0  ;;  %v919_v55 = vld [vmem:[%s1264_s2] ss:$0 sm:$0xff]  ;;  %vm594_vm13 = vcmask 392448   ;;  %vm656_vm14 = vcmask 523648  }
  0x1a   : > { %279 = vadd.xlane.f32.xlu0 %v278_v1 }
  0x1b   : > { %v922_v3 = vpop.eup %921 }
  0x1c   : > { %v282_v4 = vmul.f32 32.0, %v922_v3  ;;  %vm286_vm1 = vweird.f32 %v922_v3  ;;  %402 = vmatpush.bf16.msra.mxu1 %v803_v7 }
  0x1e   : > { %v283_v8 = vsub.f32 1.0, %v282_v4 }
  0x20   : > { %v284_v9 = vmul.f32 %v922_v3, %v283_v8  ;;  %338 = vrot.lane.b32.xlu2 %v815_v27, %s1024_s20 }
  0x22   : > { %366 = vadd.xlane.f32.xlu0 %v278_v1  ;;  %v285_v10 = vadd.f32 %v922_v3, %v284_v9 }
  0x24   : > { %v287_v11 = vsel %vm286_vm1, %v922_v3, %v285_v10 }
  0x36   : > { %332 = vrot.lane.b32.xlu0 %v803_v7, %s1024_s20 }
  0x72   : > { %v337_v31 = vpop.permute.xlu2 %336 }
  0x7a   : > { %v339_v32 = vpop.permute.xlu2 %338 }
  0x7b   : > { %v342_v33 = vsel %vm340_vm2, %v337_v31, %v339_v32 }
  0x7c   : > { %354 = vmatpush.bf16.msra.mxu0 %v342_v33 }
  0x8d   : > { %v280_v12 = vpop.xlane.xlu0 %279 }
  0x8e   : > { %v288_v13 = vmul.f32 %v287_v11, %v280_v12 }
  0x90   : > { %v289_v14 = vsub.f32 %v276_v0, %v288_v13 }
  0x92   : > { %v290_v15 = vmul.f32 %v289_v14, %v289_v14 }
  0x94   : > { %v291_v16 = vsel %vm277_vm0, %v290_v15, 0.0 }
  0x95   : > { %292 = vadd.xlane.f32.xlu1 %v291_v16  ;;  %v367_v17 = vpop.xlane.xlu0 %366 }
  0x96   : > { %v368_v18 = vmul.f32 %v367_v17, %v287_v11 }
  0x98   : > { %v369_v22 = vsub.f32 %v276_v0, %v368_v18 }
  0x9a   : > { %v370_v23 = vmul.f32 %v369_v22, %v369_v22 }
  0x9c   : > { %v371_v26 = vsel %vm277_vm0, %v370_v23, 0.0 }
  0x9d   : > { %372 = vadd.xlane.f32.xlu1 %v371_v26 }
  0xa8   : > { %v333_v58 = vpop.permute.xlu0 %332 }
  0xb6   : > { %334 = vrot.lane.b32.xlu1 %v807_v30, %s1024_s20 }
 0x108   : > { %v293_v34 = vpop.xlane.xlu1 %292 }
 0x109   : > { %v294_v35 = vmul.f32 %v293_v34, %v287_v11 }
 0x10b   : > { %v295_v36 = vadd.f32 1e-05, %v294_v35 }
 0x10d   : > { %923 = vrsqrt.f32 %v295_v36  ;;  %vm302_vm4 = vweird.f32 %v295_v36 }
 0x110   : > { %v373_v37 = vpop.xlane.xlu1 %372 }
 0x111   : > { %v374_v38 = vmul.f32 %v373_v37, %v287_v11 }
 0x113   : > { %v924_v39 = vpop.eup %923  ;;  %v375_v40 = vadd.f32 1e-05, %v374_v38 }
 0x114   : > { %v297_v41 = vmul.f32 %v924_v39, %v295_v36  ;;  %vm303_vm3 = vweird.f32 %v924_v39 }
 0x115   : > { %925 = vrsqrt.f32 %v375_v40  ;;  %vm304_vm5 = vmor %vm302_vm4, %vm303_vm3  ;;  %vm382_vm7 = vweird.f32 %v375_v40 }
 0x116   : > { %v298_v42 = vmul.f32 %v924_v39, %v297_v41 }
 0x118   : > { %v299_v43 = vmul.f32 0.5, %v298_v42 }
 0x11a   : > { %v300_v44 = vsub.f32 1.5, %v299_v43 }
 0x11b   : > { %v926_v45 = vpop.eup %925 }
 0x11c   : > { %v301_v46 = vmul.f32 %v924_v39, %v300_v44  ;;  %v377_v47 = vmul.f32 %v926_v45, %v375_v40  ;;  %vm383_vm6 = vweird.f32 %v926_v45 }
 0x11d   : > { %vm384_vm8 = vmor %vm382_vm7, %vm383_vm6 }
 0x11e   : > { %v305_v48 = vsel %vm304_vm5, %v924_v39, %v301_v46  ;;  %v378_v49 = vmul.f32 %v926_v45, %v377_v47 }
 0x11f   : > { %v306_v50 = vmul.f32 %v305_v48, %v289_v14 }
 0x120   : > { %v379_v52 = vmul.f32 0.5, %v378_v49 }
 0x121   : > { %v310_v54 = vmul.f32 %v918_v51, %v306_v50 }
 0x122   : > { %v380_v53 = vsub.f32 1.5, %v379_v52 }
 0x123   : > { %v314_v59 = vadd.f32 %v919_v55, %v310_v54 }
 0x124   : > { %v381_v56 = vmul.f32 %v926_v45, %v380_v53 }
 0x125   : > { %v315_v0 = vpack.c.bf16 %v314_v59, %v314_v59 }
 0x126   : > { %v385_v57 = vsel %vm384_vm8, %v926_v45, %v381_v56 }
 0x127   : > { %v386_v60 = vmul.f32 %v385_v57, %v369_v22 }
 0x128   : > { %v335_v61 = vpop.permute.xlu1 %334 }
 0x129   : > { %v341_v62 = vsel %vm340_vm2, %v333_v58, %v335_v61  ;;  %v387_v63 = vmul.f32 %v918_v51, %v386_v60 }
 0x12a   : > { %355 = vmatpush.bf16.msra.mxu0 %v341_v62 }
 0x12b   : > { %v388_v1 = vadd.f32 %v919_v55, %v387_v63 }
 0x12d   : > { %816 = vmatmul.msk.bf16.vlgmr.msra.gmra.mxu0 %vm277_vm0, %v315_v0  ;;  %v389_v2 = vpack.c.bf16 %v388_v1, %v388_v1 }
 0x12f   : > { %817 = vmatmul.msk.bf16.vlgmr.msra.gmra.mxu1 %vm277_vm0, %v389_v2 }
 0x1aa   : > { %v357_v3 = vpop.f32.mrf.mxu0 }
 0x1ab   : > { %v361_v4 = vpack.c.bf16 %v357_v3, %v357_v3 }
 0x1ac   : > { %v404_v5 = vpop.f32.mrf.mxu1 }
 0x1ad   : > { %v444_v6 = vunpack.c.l.b16 %v361_v4  ;;  %v415_v7 = vsel %vm410_vm9, %v361_v4, 0  ;;  %v408_v9 = vmul.f32 0.25, %v404_v5 }
 0x1ae   : > { %424 = vmatpush.bf16.xpose.msra.mxu2 %v415_v7 }
 0x1af   : > { %v1168_v8 = vpack.c.b16 %v444_v6, %v444_v6  ;;  %v409_v11 = vpack.c.bf16 %v408_v9, %v408_v9 }
 0x1b1   : > { %446 = vrot.lane.b32.xlu1 %v1168_v8, %s1024_s20  ;;  %v470_v13 = vunpack.c.l.b16 %v409_v11  ;;  %s1028_s20 = smov 48  }
 0x1b2   : > { %v359_v10 = vpop.f32.mrf.mxu0 }
 0x1b3   : > { %v471_v14 = vpack.c.b16 %v470_v13, %v470_v13 }
 0x1b4   : > { %v406_v12 = vpop.f32.mrf.mxu1 }
 0x1b5   : > { %818 = vmatmul.msk.bf16.vlgmr.msra.gmra.mxu2 %vm410_vm9, %v409_v11 }
 0x1b9   : > { %474 = vrot.lane.b32.xlu1 %v1168_v8, %s1025_s8 }
 0x1c1   : > { %472 = vrot.lane.b32.xlu1 %v471_v14, %s1025_s8  ;;  %s254_s8 = sand.u32 1, %s1005_s22  }
 0x1c9   : > { %598 = vrot.lane.b32.xlu1 %v1168_v8, %s1026_s11 }
 0x1d1   : > { %534 = vrot.lane.b32.xlu1 %v471_v14, %s1027_s12 }
 0x223   : > { %v447_v15 = vpop.permute.xlu1 %446 }
 0x224   : > { %v453_v16 = vsel %vm451_vm10, %v447_v15, 0 }
 0x225   : > { %462 = vmatpush.bf16.msra.mxu3 %v453_v16 }
 0x22b   : > { %v475_v17 = vpop.permute.xlu1 %474 }
 0x22c   : > { %v480_v18 = vsel %vm410_vm9, %v475_v17, 0 }
 0x22d   : > { %489 = vmatpush.bf16.xpose.msrb.mxu3 %v480_v18 }
 0x233   : > { %v473_v22 = vpop.permute.xlu1 %472 }
 0x238   : > { %v426_v19 = vpop.f32.mrf.mxu2 }
 0x239   : > { %v431_v20 = vsel %vm430_vm11, %v426_v19, -inf }
 0x23a   : > { %432 = vmax.xlane.f32.xlu2 %v431_v20 }
 0x23b   : > { %v599_v26 = vpop.permute.xlu1 %598 }
 0x23c   : > { %v604_v36 = vsel %vm410_vm9, %v599_v26, 0  ;;  %v852_v26 = vld [vmem:[%s1266_s4 + $0x8] sm:$0xff] }
 0x240   : > { %v428_v21 = vpop.f32.mrf.mxu2 }
 0x243   : > { %v535_v31 = vpop.permute.xlu1 %534 }
 0x252   : > { %536 = vrot.lane.b32.xlu2 %v1168_v8, %s1027_s12  ;;  %s798_s12 = sshll.u32 %s254_s8, 3 }
 0x253   : > { %s256_s17 = scalar_lea.vmem [#allocation3], %s798_s12  ;;  %s963_s12 = scalar_lea.hbm %s1268_s6, 16 }
 0x254   : > { %s720_s18 = sshll.u32 %s256_s17, 4  ;;  %s721_s18 = int_to_ptr.vmem [resolvable:$true] %s720_s18 }
 0x2ad   : > { %v433_v23 = vpop.xlane.xlu2 %432 }
 0x2ae   : > { %v434_v24 = vsub.f32 %v426_v19, %v433_v23 }
 0x2b0   : > { %v435_v25 = vmul.f32 1.442695, %v434_v24  ;;  %v854_v24 = vld [vmem:[%s1266_s4 + $0x18] sm:$0xff] }
 0x2b2   : > { %927 = vpow2.f32 %v435_v25  ;;  %v853_v25 = vld [vmem:[%s1266_s4 + $0x10] sm:$0xff] }
 0x2b5   : > { %v537_v27 = vpop.permute.xlu2 %536 }
 0x2b6   : > { %v542_v28 = vsel %vm410_vm9, %v537_v27, 0  ;;  %v851_v27 = vld [vmem:[%s1266_s4] sm:$0xff] }
 0x2b7   : > { %551 = vmatpush.bf16.xpose.msrb.mxu1 %v542_v28 }
 0x2b8   : > { %v928_v29 = vpop.eup %927 }
 0x2b9   : > { %v437_v30 = vsel %vm430_vm11, %v928_v29, 0.0 }
 0x2ba   : > { %438 = vadd.xlane.f32.xlu0 %v437_v30 }
 0x2be   : > { %822 = vmatmul.msk.bf16.vlgmr.msrb.gmra.mxu1 %vm410_vm9, %v535_v31 }
 0x2bf   : > { %696 = vmatpush.bf16.msra.mxu1 %v854_v24 }
 0x2c3   : > { %697 = vmatpush.bf16.msra.mxu1 %v853_v25 }
 0x2c7   : > { %698 = vmatpush.bf16.msra.mxu1 %v852_v26 }
 0x2cb   : > { %699 = vmatpush.bf16.msra.mxu1 %v851_v27 }
 0x2ce   : > { %596 = vrot.lane.b32.xlu0 %v471_v14, %s1026_s11  ;;  %s844_s11 = sshll.u32 %s1013_s24, 3  ;;  %s707_s24 = scalar_lea.sflag [#allocation4], %s254_s8 }
 0x32d   : > { %v439_v32 = vpop.xlane.xlu0 %438 }
 0x32e   : > { %929 = vrcp.f32 %v439_v32 }
 0x334   : > { %v930_v33 = vpop.eup %929 }
 0x335   : > { %v441_v34 = vmul.f32 %v930_v33, %v928_v29  ;;  %v920_v33 = vld [vmem:[%s1267_s5] ss:$0 sm:$0xff] }
 0x337   : > { %v442_v35 = vpack.c.bf16 %v441_v34, %v441_v34 }
 0x339   : > { %819 = vmatmul.msk.bf16.vlgmr.msra.gmra.mxu3 %vm430_vm11, %v442_v35 }
 0x33a   : > { %613 = vmatpush.bf16.xpose.msra.mxu3 %v604_v36 }
 0x33b   : > { %v553_v37 = vpop.f32.mrf.mxu1 }
 0x33c   : > { %v557_v38 = vsel %vm430_vm11, %v553_v37, -inf }
 0x33d   : > { %558 = vmax.xlane.f32.xlu2 %v557_v38 }
 0x340   : > { %v597_v40 = vpop.permute.xlu0 %596 }
 0x343   : > { %v555_v39 = vpop.f32.mrf.mxu1 }
 0x349   : > { %820 = vmatmul.msk.bf16.vlgmr.msrb.gmra.mxu3 %vm410_vm9, %v473_v22 }
 0x359   : > { %824 = vmatmul.msk.bf16.vlgmr.msra.gmra.mxu3 %vm410_vm9, %v597_v40 }
 0x3b0   : > { %v559_v41 = vpop.xlane.xlu2 %558 }
 0x3b1   : > { %v560_v42 = vsub.f32 %v553_v37, %v559_v41 }
 0x3b3   : > { %v561_v43 = vmul.f32 1.442695, %v560_v42 }
 0x3b5   : > { %931 = vpow2.f32 %v561_v43 }
 0x3bb   : > { %v932_v44 = vpop.eup %931 }
 0x3bc   : > { %v464_v45 = vpop.f32.mrf.mxu3  ;;  %v563_v46 = vsel %vm430_vm11, %v932_v44, 0.0 }
 0x3bd   : > { %468 = vst.msk [vmem:[#allocation2] sm:$0xff] %vm410_vm9, %v464_v45  ;;  %564 = vadd.xlane.f32.xlu2 %v563_v46 }
 0x3c4   : > { %v466_v47 = vpop.f32.mrf.mxu3 }
 0x3cc   : > { %v491_v48 = vpop.f32.mrf.mxu3 }
 0x3cd   : > { %v495_v49 = vsel %vm430_vm11, %v491_v48, -inf }
 0x3ce   : > { %496 = vmax.xlane.f32.xlu1 %v495_v49 }
 0x3d4   : > { %v493_v50 = vpop.f32.mrf.mxu3 }
 0x3dc   : > { %v615_v51 = vpop.f32.mrf.mxu3 }
 0x3dd   : > { %v619_v52 = vsel %vm430_vm11, %v615_v51, -inf }
 0x3de   : > { %620 = vmax.xlane.f32.xlu0 %v619_v52 }
 0x3e4   : > { %v617_v53 = vpop.f32.mrf.mxu3 }
 0x3e7   : > { %507 = vrot.lane.b32.xlu1 %v1168_v8, %s1028_s20 }
 0x3f2   : > { %569 = vrot.lane.b32.xlu0 %v1168_v8, %s1029_s13 }
 0x430   : > { %v565_v62 = vpop.xlane.xlu2 %564 }
 0x441   : > { %v497_v54 = vpop.xlane.xlu1 %496 }
 0x442   : > { %v498_v55 = vsub.f32 %v491_v48, %v497_v54 }
 0x444   : > { %v499_v56 = vmul.f32 1.442695, %v498_v55 }
 0x446   : > { %933 = vpow2.f32 %v499_v56 }
 0x44c   : > { %v934_v57 = vpop.eup %933 }
 0x44d   : > { %v501_v58 = vsel %vm430_vm11, %v934_v57, 0.0 }
 0x44e   : > { %502 = vadd.xlane.f32.xlu2 %v501_v58 }
 0x451   : > { %v621_v59 = vpop.xlane.xlu0 %620 }
 0x452   : > { %v622_v60 = vsub.f32 %v615_v51, %v621_v59 }
 0x454   : > { %v623_v61 = vmul.f32 1.442695, %v622_v60 }
 0x456   : > { %935 = vpow2.f32 %v623_v61 }
 0x457   : > { %937 = vrcp.f32 %v565_v62 }
 0x459   : > { %v508_v63 = vpop.permute.xlu1 %507 }
 0x45a   : > { %v513_v0 = vsel %vm451_vm10, %v508_v63, 0 }
 0x45b   : > { %522 = vmatpush.bf16.msrb.mxu0 %v513_v0 }
 0x45c   : > { %v936_v1 = vpop.eup %935 }
 0x45d   : > { %v625_v2 = vsel %vm430_vm11, %v936_v1, 0.0  ;;  %v938_v3 = vpop.eup %937 }
 0x45e   : > { %626 = vadd.xlane.f32.xlu2 %v625_v2  ;;  %v567_v4 = vmul.f32 %v938_v3, %v932_v44 }
 0x460   : > { %v568_v7 = vpack.c.bf16 %v567_v4, %v567_v4 }
 0x464   : > { %v570_v5 = vpop.permute.xlu0 %569 }
 0x465   : > { %v575_v6 = vsel %vm451_vm10, %v570_v5, 0 }
 0x466   : > { %584 = vmatpush.bf16.msrb.mxu2 %v575_v6 }
 0x469   : > { %823 = vmatmul.msk.bf16.vlgmr.msrb.gmra.mxu2 %vm430_vm11, %v568_v7 }
 0x476   : > { %631 = vrot.lane.b32.xlu2 %v1168_v8, %s1030_s14 }
 0x4c1   : > { %v503_v9 = vpop.xlane.xlu2 %502 }
 0x4c2   : > { %939 = vrcp.f32 %v503_v9 }
 0x4c8   : > { %v940_v10 = vpop.eup %939 }
 0x4c9   : > { %v505_v11 = vmul.f32 %v940_v10, %v934_v57 }
 0x4cb   : > { %v506_v12 = vpack.c.bf16 %v505_v11, %v505_v11 }
 0x4cd   : > { %821 = vmatmul.msk.bf16.vlgmr.msrb.gmra.mxu0 %vm430_vm11, %v506_v12 }
 0x4d1   : > { %v627_v13 = vpop.xlane.xlu2 %626 }
 0x4d2   : > { %941 = vrcp.f32 %v627_v13 }
 0x4d8   : > { %v942_v14 = vpop.eup %941 }
 0x4d9   : > { %v629_v15 = vmul.f32 %v942_v14, %v936_v1  ;;  %v632_v16 = vpop.permute.xlu2 %631 }
 0x4da   : > { %v637_v17 = vsel %vm451_vm10, %v632_v16, 0 }
 0x4db   : > { %v630_v18 = vpack.c.bf16 %v629_v15, %v629_v15  ;;  %646 = vmatpush.bf16.msra.mxu0 %v637_v17 }
 0x4de   : > { %825 = vmatmul.msk.bf16.vlgmr.msra.gmra.mxu0 %vm430_vm11, %v630_v18 }
 0x4ec   : > { %v586_v19 = vpop.f32.mrf.mxu2 }
 0x4f4   : > { %v588_v8 = vpop.f32.mrf.mxu2 }
 0x54a   : > { %v524_v20 = vpop.f32.mrf.mxu0 }
 0x54b   : > { %529 = vrot.lane.b32.xlu1 %v524_v20, %s1030_s14  ;;  %s718_s14 = scalar_lea.hbm %s1268_s6, %s844_s11 }
 0x54c   : > { %s722_s19 = sshll.u32 %s718_s14, 4  ;;  %s723_s19 = int_to_ptr.hbm [resolvable:$true] %s722_s19 }
 0x54d   : > { %s957_s27 = sshra.s32 %s723_s19, 4  ;;  %s958_s27 = int_to_ptr.hbm [resolvable:$true] %s957_s27 }
 0x54e   : > { %s959_s28 = scalar_lea.hbm %s958_s27, 8  ;;  %p964_p1 = scmp.lt.s32.totalorder %s958_s27, %s1268_s6 }
 0x54f   : > { %p960_p12 = scmp.ne.s32.totalorder %s958_s27, %s959_s28  ;;  %p965_p2 = scmp.lt.s32.totalorder %s963_s12, %s959_s28 }
 0x551   : > { %p961_p13 = pnand %p960_p12, %p1106_p4  ;;  %p966_p3 = por %p965_p2, %p964_p1 }
 0x552   : > { %v526_v21 = vpop.f32.mrf.mxu0 }
 0x553   : > { %591 = vrot.lane.b32.xlu1 %v586_v19, %s1029_s13  ;;  %p962_p0 = pneg %p961_p13 }
 0x555   : > { %p967_p5 = pnand %p966_p3, %p962_p0 }
 0x55b   : > { %v648_v22 = vpop.f32.mrf.mxu0 }
 0x55c   : > { %653 = vrot.lane.b32.xlu0 %v648_v22, %s1028_s20 }
 0x563   : > { %v650_v23 = vpop.f32.mrf.mxu0 }
 0x5bd   : > { %v530_v28 = vpop.permute.xlu1 %529 }
 0x5be   : > { %533 = vst.msk [vmem:[#allocation2] sm:$0xff] %vm532_vm12, %v530_v28 }
 0x5c5   : > { %v592_v29 = vpop.permute.xlu1 %591 }
 0x5c6   : > { %595 = vst.msk [vmem:[#allocation2] sm:$0xff] %vm594_vm13, %v592_v29 }
 0x5ce   : > { %v654_v30 = vpop.permute.xlu0 %653 }
 0x5cf   : > { %657 = vst.msk [vmem:[#allocation2] sm:$0xff] %vm656_vm14, %v654_v30 }
 0x5d6   : > { %v658_v31 = vld [vmem:[#allocation2] sm:$0xff] }
 0x5d7   : > { %v659_v32 = vpack.c.bf16 %v658_v31, %v658_v31 }
 0x5d9   : > { %842 = vmatmul.msk.bf16.vlgmr.msra.gmra.mxu1 %vm340_vm2, %v659_v32 }
 0x656   : > { %v701_v34 = vpop.f32.mrf.mxu1 }
 0x657   : > { %v702_v35 = vadd.f32 %v920_v33, %v701_v34 }
 0x659   : > { %705 = vst.msk [vmem:[%s256_s17] sm:$0xff] %vm277_vm0, %v702_v35 }
 0x65a   : > { %970 = shalt.err (!%p967_p5)
}
 0x65b   : > { %855 = dma.vmem_to_hbm [thread:$0]  (%p1106_p4), %s721_s18, 128, %s723_s19, %s707_s24  }
 0x65e   : > { %v703_v36 = vpop.f32.mrf.mxu1 }
 0x65f PF: > { %p861_p6 = scmp.ge.s32.totalorder %s1021_s26, 2  ;;  %s734_s8 = sand.u32 1, %s1001_s21  }
 0x660   : > { %s735_s14 = scalar_lea.sflag [#allocation4], %s734_s8 }
 0x661   : > { %p858_p7 = pnand %p861_p6, %p1113_p8 }
 0x663   : > { %p859_p9 = pneg %p858_p7 }
 0x665   : > { %996 = dma.done.wait (%p859_p9), %s735_s14, 128  }
 0x666   : > { %998 = vsyncadd (%p859_p9), %s735_s14, 4294967168  ;;  %s19_s26 = sadd.s32 1, %s1021_s26   ;;  %s1271_s21 = smov %s1005_s22 }
 0x667   : > { %p16_p10 = scmp.ge.s32.totalorder %s19_s26, 4   ;;  %s1272_s22 = smov %s1009_s23 }
 0x668   : > { %s1273_s23 = smov %s1119_s10  ;;  %s1274_s24 = smov %s1017_s25 }
 0x669   : > { %s1275_s25 = smov %s1277_s29  ;;  %18 = sbr.rel (!%p16_p10) target bundleno = 4 (0x4), region = 80 }
 0x66e   :  { %741 = vsyncpa [#allocation4], 1 }
 0x66f   :  { %743 = vsyncpa [#allocation4 + $0x1], 1 }

</bundles_post_ra>
